<compile_context>
chip_gen: v6e
topology: v6e:2x2x1
jax: 0.10.0
libtpu: 0.0.40
codegen_flags: <defaults>
</compile_context>

<pallas_src>
import functools

import numpy as np
import jax
import jax.numpy as jnp
from jax.experimental import pallas as pl
from jax.experimental.pallas import tpu as pltpu

EPS = 1e-5


def _double_conv_kernel(lhs1_ref, w1_ref, w2_ref, g1_ref, b1_ref, g2_ref,
                        b2_ref, gg1_ref, gg2_ref, o_ref, *, B, H, W):
    """All operands are 2D lane-dense slabs.

    lhs1_ref: (H*B, 3*W*Cin)   im2col'd conv1 input (dy outermost in lanes)
    w1_ref  : (3*W*Cin,  W*Cmid)  stacked banded conv1 weights
    w2_ref  : (3*W*Cmid, W*Cout)  stacked banded conv2 weights
    g*/b*   : (1, W*C)         gamma/beta tiled to the (w, c) lane layout
    gg*     : (W*C, W*C)       channel group-sum matrix (1 iff same channel)
    o_ref   : (H*B, W*Cout)
    """
    R = H * B
    inv_n = 1.0 / float(B * H * W)          # BN sample count per channel

    # ---- conv1: one MXU matmul (dy and dx taps folded into stacked weights) ----
    acc1 = jnp.dot(lhs1_ref[...], w1_ref[...],
                   preferred_element_type=jnp.float32)          # (R, W*Cmid)

    # ---- BatchNorm1 (single pass) + ReLU: one small dot for both moments ----
    s1 = jnp.sum(acc1, axis=0, keepdims=True)                   # (1, W*Cmid)
    q1 = jnp.sum(acc1 * acc1, axis=0, keepdims=True)            # (1, W*Cmid)
    mom1 = jnp.dot(jnp.concatenate([s1, q1], axis=0), gg1_ref[...],
                   preferred_element_type=jnp.float32) * inv_n  # (2, W*Cmid)
    m1 = mom1[0:1, :]
    v1 = mom1[1:2, :] - m1 * m1
    scale1 = g1_ref[...] * jax.lax.rsqrt(v1 + EPS)
    shift1 = b1_ref[...] - m1 * scale1
    h1 = jnp.maximum(acc1 * scale1 + shift1, 0.0)               # (R, W*Cmid)

    # ---- conv2: 2D H-halo (sublane concat) + aligned lane im2col + one matmul ----
    WCmid = h1.shape[1]
    zB = jnp.zeros((B, WCmid), jnp.float32)
    h1p = jnp.concatenate([zB, h1, zB], axis=0)                 # ((H+2)*B, W*Cmid)
    lhs2 = jnp.concatenate(
        [h1p[0:R, :], h1p[B:B + R, :], h1p[2 * B:2 * B + R, :]],
        axis=1)                                                 # (R, 3*W*Cmid)
    acc2 = jnp.dot(lhs2, w2_ref[...],
                   preferred_element_type=jnp.float32)          # (R, W*Cout)

    # ---- BatchNorm2 + ReLU, lane-dense store (last dim = W*Cout) ----
    s2 = jnp.sum(acc2, axis=0, keepdims=True)
    q2 = jnp.sum(acc2 * acc2, axis=0, keepdims=True)
    mom2 = jnp.dot(jnp.concatenate([s2, q2], axis=0), gg2_ref[...],
                   preferred_element_type=jnp.float32) * inv_n
    m2 = mom2[0:1, :]
    v2 = mom2[1:2, :] - m2 * m2
    scale2 = g2_ref[...] * jax.lax.rsqrt(v2 + EPS)
    shift2 = b2_ref[...] - m2 * scale2
    o_ref[...] = jnp.maximum(acc2 * scale2 + shift2, 0.0).astype(o_ref.dtype)


def _stacked_banded_weights(w_hwio, W):
    """Fold the 3 W-taps (and W zero-padding) of a 3x3 conv weight into a
    banded matmul weight and stack the 3 H-taps (dy) along K:
      out (3*W*Cin, W*Cout) with
      out[dy*W*Cin + w_in*Cin + ci, w_out*Cout + co] = w_hwio[dy, w_in-w_out+1, ci, co].
    TODO(synk): at realistic W/C this dense banded form must become block-banded
    per 128-lane W-tile (it is O((W*C)^2) per dy)."""
    Cin, Cout = w_hwio.shape[2], w_hwio.shape[3]
    sel = np.zeros((3, W, W), np.float32)           # sel[dx, w_in, w_out]
    for dx in range(3):
        for w_out in range(W):
            w_in = w_out + dx - 1
            if 0 <= w_in < W:
                sel[dx, w_in, w_out] = 1.0
    banded = jnp.einsum("xab,yxio->yaibo", sel, w_hwio.astype(jnp.float32))
    return banded.reshape(3 * W * Cin, W * Cout)


def double_conv_pallas(x_nchw, w1, w2, g1, b1, g2, b2):
    """x_nchw: (B, Cin, H, W).  Conv weights are HWIO.  gamma/beta are (C,).
    Returns (B, Cout, H, W)."""
    B, Cin, H, W = x_nchw.shape
    Cmid, Cout = w1.shape[3], w2.shape[3]
    WCin, WCmid, WCout = W * Cin, W * Cmid, W * Cout
    R = H * B

    # Lane-dense 2D input slab (rows = H*B, H-major / B fastest), H-halo rows of
    # zeros, then im2col along lanes: lhs1[r, dy*WCin + k] = x_pad[r + dy*B, k].
    # NOTE: these transposes are wrapper-side layout plumbing; if the surrounding
    # model produced NHWC / the slab layout directly they would disappear.
    x_hb = jnp.transpose(x_nchw, (2, 0, 3, 1)).astype(jnp.float32)   # (H,B,W,Cin)
    x_pad = jnp.pad(x_hb.reshape(H, B, WCin), ((1, 1), (0, 0), (0, 0)))
    x_pad = x_pad.reshape((H + 2) * B, WCin)                          # 2D slab
    lhs1 = jnp.concatenate(
        [x_pad[0:R], x_pad[B:B + R], x_pad[2 * B:2 * B + R]], axis=1)  # (R, 3*WCin)

    # One-time weight/layout plumbing (done in XLA, outside the kernel).
    w1s = _stacked_banded_weights(w1, W)             # (3*WCin,  WCmid)
    w2s = _stacked_banded_weights(w2, W)             # (3*WCmid, WCout)
    g1t = jnp.tile(g1.astype(jnp.float32), W)[None, :]
    b1t = jnp.tile(b1.astype(jnp.float32), W)[None, :]
    g2t = jnp.tile(g2.astype(jnp.float32), W)[None, :]
    b2t = jnp.tile(b2.astype(jnp.float32), W)[None, :]
    gg1 = jnp.tile(jnp.eye(Cmid, dtype=jnp.float32), (W, W))         # (WCmid, WCmid)
    gg2 = jnp.tile(jnp.eye(Cout, dtype=jnp.float32), (W, W))         # (WCout, WCout)

    kernel = functools.partial(_double_conv_kernel, B=B, H=H, W=W)

    out = pl.pallas_call(
        kernel,
        out_shape=jax.ShapeDtypeStruct((R, WCout), jnp.float32),
        grid_spec=pltpu.PrefetchScalarGridSpec(
            num_scalar_prefetch=0,
            grid=(1,),
            in_specs=[
                pl.BlockSpec((R, 3 * WCin), lambda i: (0, 0)),
                pl.BlockSpec((3 * WCin, WCmid), lambda i: (0, 0)),
                pl.BlockSpec((3 * WCmid, WCout), lambda i: (0, 0)),
                pl.BlockSpec((1, WCmid), lambda i: (0, 0)),
                pl.BlockSpec((1, WCmid), lambda i: (0, 0)),
                pl.BlockSpec((1, WCout), lambda i: (0, 0)),
                pl.BlockSpec((1, WCout), lambda i: (0, 0)),
                pl.BlockSpec((WCmid, WCmid), lambda i: (0, 0)),
                pl.BlockSpec((WCout, WCout), lambda i: (0, 0)),
            ],
            out_specs=pl.BlockSpec((R, WCout), lambda i: (0, 0)),
        ),
        compiler_params=pltpu.CompilerParams(
            dimension_semantics=("arbitrary",),
            vmem_limit_bytes=32 * 1024 * 1024,   # safe on v5e/v6e/v7x at this size
        ),
    )(lhs1, w1s, w2s, g1t, b1t, g2t, b2t, gg1, gg2)

    # (H*B, W*Cout) -> (B, Cout, H, W); reshape is free, one transpose back.
    return jnp.transpose(out.reshape(H, B, W, Cout), (1, 3, 0, 2))


def double_conv_ref(x_nchw, w1, w2, g1, b1, g2, b2):
    """Pure-JAX reference (PyTorch training-mode BN semantics)."""
    x = jnp.transpose(x_nchw, (0, 2, 3, 1)).astype(jnp.float32)

    def conv(y, w):
        dn = jax.lax.conv_dimension_numbers(y.shape, w.shape,
                                            ("NHWC", "HWIO", "NHWC"))
        return jax.lax.conv_general_dilated(y, w, (1, 1), "SAME",
                                            dimension_numbers=dn)

    def bn_relu(y, g, b):
        m = y.mean(axis=(0, 1, 2))
        v = ((y - m) ** 2).mean(axis=(0, 1, 2))
        return jnp.maximum((y - m) * jax.lax.rsqrt(v + EPS) * g + b, 0.0)

    y = bn_relu(conv(x, w1), g1, b1)
    z = bn_relu(conv(y, w2), g2, b2)
    return jnp.transpose(z, (0, 3, 1, 2))


if __name__ == "__main__":
    # Small shapes consistent with the module: in=4, mid=out=8 channels, 16x16.
    B, Cin, Cmid, Cout, H, W = 2, 4, 8, 8, 16, 16

    key = jax.random.PRNGKey(0)
    k1, k2, k3, k4, k5, k6, kx = jax.random.split(key, 7)

    # Conv weights in HWIO layout (kh, kw, cin, cout); bias=False in the module.
    w1 = 0.1 * jax.random.normal(k1, (3, 3, Cin, Cmid), jnp.float32)
    w2 = 0.1 * jax.random.normal(k2, (3, 3, Cmid, Cout), jnp.float32)
    # BatchNorm affine params (gamma, beta), perturbed for a non-trivial check.
    g1 = 1.0 + 0.1 * jax.random.normal(k3, (Cmid,), jnp.float32)
    b1 = 0.1 * jax.random.normal(k4, (Cmid,), jnp.float32)
    g2 = 1.0 + 0.1 * jax.random.normal(k5, (Cout,), jnp.float32)
    b2 = 0.1 * jax.random.normal(k6, (Cout,), jnp.float32)

    x = jax.random.normal(kx, (B, Cin, H, W), jnp.float32)

    out = double_conv_pallas(x, w1, w2, g1, b1, g2, b2)
    out = jax.block_until_ready(out)

    ref = jax.block_until_ready(double_conv_ref(x, w1, w2, g1, b1, g2, b2))
    assert out.shape == (B, Cout, H, W)
    assert jnp.allclose(out, ref, atol=2e-4, rtol=2e-4), "mismatch vs reference"

    print("KERNEL_OK")
</pallas_src>

<mosaic_0001>
module attributes {stable_mosaic.version = 11 : i64} {
  func.func @_double_conv_kernel(%arg0: i32, %arg1: memref<32x192xf32, #tpu.memory_space<vmem>>, %arg2: memref<192x128xf32, #tpu.memory_space<vmem>>, %arg3: memref<384x128xf32, #tpu.memory_space<vmem>>, %arg4: memref<1x128xf32, #tpu.memory_space<vmem>>, %arg5: memref<1x128xf32, #tpu.memory_space<vmem>>, %arg6: memref<1x128xf32, #tpu.memory_space<vmem>>, %arg7: memref<1x128xf32, #tpu.memory_space<vmem>>, %arg8: memref<128x128xf32, #tpu.memory_space<vmem>>, %arg9: memref<128x128xf32, #tpu.memory_space<vmem>>, %arg10: memref<32x128xf32, #tpu.memory_space<vmem>>) attributes {dimension_semantics = [#tpu.dimension_semantics<arbitrary>], iteration_bounds = array<i64: 1>, scalar_prefetch = 0 : i64, scratch_operands = 0 : i64, tpu.core_type = #tpu.core_type<tc>, window_params = [{pipeline_mode = #tpu.pipeline_mode<synchronous>, transform_indices = @transform_0, window_bounds = array<i64: 32, 192>}, {pipeline_mode = #tpu.pipeline_mode<synchronous>, transform_indices = @transform_1, window_bounds = array<i64: 192, 128>}, {pipeline_mode = #tpu.pipeline_mode<synchronous>, transform_indices = @transform_2, window_bounds = array<i64: 384, 128>}, {pipeline_mode = #tpu.pipeline_mode<synchronous>, transform_indices = @transform_3, window_bounds = array<i64: 1, 128>}, {pipeline_mode = #tpu.pipeline_mode<synchronous>, transform_indices = @transform_4, window_bounds = array<i64: 1, 128>}, {pipeline_mode = #tpu.pipeline_mode<synchronous>, transform_indices = @transform_5, window_bounds = array<i64: 1, 128>}, {pipeline_mode = #tpu.pipeline_mode<synchronous>, transform_indices = @transform_6, window_bounds = array<i64: 1, 128>}, {pipeline_mode = #tpu.pipeline_mode<synchronous>, transform_indices = @transform_7, window_bounds = array<i64: 128, 128>}, {pipeline_mode = #tpu.pipeline_mode<synchronous>, transform_indices = @transform_8, window_bounds = array<i64: 128, 128>}, {pipeline_mode = #tpu.pipeline_mode<synchronous>, transform_indices = @transform_9, window_bounds = array<i64: 32, 128>}]} {
    %c0 = arith.constant 0 : index
    %c0_0 = arith.constant 0 : index
    %0 = vector.load %arg1[%c0, %c0_0] : memref<32x192xf32, #tpu.memory_space<vmem>>, vector<32x192xf32>
    %c0_1 = arith.constant 0 : index
    %c0_2 = arith.constant 0 : index
    %1 = vector.load %arg2[%c0_1, %c0_2] : memref<192x128xf32, #tpu.memory_space<vmem>>, vector<192x128xf32>
    %cst = arith.constant dense<0.000000e+00> : vector<32x128xf32>
    %2 = tpu.matmul %0, %1, %cst {dimension_numbers = #tpu.dot_dimension_numbers<[1], [0], [0], [1], [0, 0, 1, 1], [], []>} : vector<32x192xf32>, vector<192x128xf32>, vector<32x128xf32> -> vector<32x128xf32>
    %cst_3 = arith.constant dense<0.000000e+00> : vector<128xf32>
    %3 = vector.multi_reduction <add>, %2, %cst_3 [0] : vector<32x128xf32> to vector<128xf32>
    %4 = vector.shape_cast %3 : vector<128xf32> to vector<1x128xf32>
    %5 = arith.mulf %2, %2 : vector<32x128xf32>
    %cst_4 = arith.constant dense<0.000000e+00> : vector<128xf32>
    %6 = vector.multi_reduction <add>, %5, %cst_4 [0] : vector<32x128xf32> to vector<128xf32>
    %7 = vector.shape_cast %6 : vector<128xf32> to vector<1x128xf32>
    %8 = tpu.concatenate %4, %7 in 0 : vector<1x128xf32>, vector<1x128xf32> -> vector<2x128xf32>
    %c0_5 = arith.constant 0 : index
    %c0_6 = arith.constant 0 : index
    %9 = vector.load %arg8[%c0_5, %c0_6] : memref<128x128xf32, #tpu.memory_space<vmem>>, vector<128x128xf32>
    %cst_7 = arith.constant dense<0.000000e+00> : vector<2x128xf32>
    %10 = tpu.matmul %8, %9, %cst_7 {dimension_numbers = #tpu.dot_dimension_numbers<[1], [0], [0], [1], [0, 0, 1, 1], [], []>} : vector<2x128xf32>, vector<128x128xf32>, vector<2x128xf32> -> vector<2x128xf32>
    %cst_8 = arith.constant 0.001953125 : f32
    %11 = vector.broadcast %cst_8 : f32 to vector<2x128xf32>
    %12 = arith.mulf %10, %11 : vector<2x128xf32>
    %13 = vector.extract_strided_slice %12 {offsets = [0, 0], sizes = [1, 128], strides = [1, 1]} : vector<2x128xf32> to vector<1x128xf32>
    %14 = vector.extract_strided_slice %12 {offsets = [1, 0], sizes = [1, 128], strides = [1, 1]} : vector<2x128xf32> to vector<1x128xf32>
    %15 = arith.mulf %13, %13 : vector<1x128xf32>
    %16 = arith.subf %14, %15 : vector<1x128xf32>
    %c0_9 = arith.constant 0 : index
    %c0_10 = arith.constant 0 : index
    %17 = vector.load %arg4[%c0_9, %c0_10] : memref<1x128xf32, #tpu.memory_space<vmem>>, vector<1x128xf32>
    %cst_11 = arith.constant 9.99999974E-6 : f32
    %18 = vector.broadcast %cst_11 : f32 to vector<1x128xf32>
    %19 = arith.addf %16, %18 : vector<1x128xf32>
    %20 = math.rsqrt %19 : vector<1x128xf32>
    %21 = arith.mulf %17, %20 : vector<1x128xf32>
    %c0_12 = arith.constant 0 : index
    %c0_13 = arith.constant 0 : index
    %22 = vector.load %arg5[%c0_12, %c0_13] : memref<1x128xf32, #tpu.memory_space<vmem>>, vector<1x128xf32>
    %23 = arith.mulf %13, %21 : vector<1x128xf32>
    %24 = arith.subf %22, %23 : vector<1x128xf32>
    %25 = vector.broadcast %21 : vector<1x128xf32> to vector<32x128xf32>
    %26 = arith.mulf %2, %25 : vector<32x128xf32>
    %27 = vector.broadcast %24 : vector<1x128xf32> to vector<32x128xf32>
    %28 = arith.addf %26, %27 : vector<32x128xf32>
    %cst_14 = arith.constant 0.000000e+00 : f32
    %29 = vector.broadcast %cst_14 : f32 to vector<32x128xf32>
    %30 = arith.maximumf %28, %29 : vector<32x128xf32>
    %cst_15 = arith.constant 0.000000e+00 : f32
    %31 = vector.broadcast %cst_15 : f32 to vector<2x128xf32>
    %32 = tpu.concatenate %31, %30, %31 in 0 : vector<2x128xf32>, vector<32x128xf32>, vector<2x128xf32> -> vector<36x128xf32>
    %33 = vector.extract_strided_slice %32 {offsets = [0, 0], sizes = [32, 128], strides = [1, 1]} : vector<36x128xf32> to vector<32x128xf32>
    %34 = vector.extract_strided_slice %32 {offsets = [2, 0], sizes = [32, 128], strides = [1, 1]} : vector<36x128xf32> to vector<32x128xf32>
    %35 = vector.extract_strided_slice %32 {offsets = [4, 0], sizes = [32, 128], strides = [1, 1]} : vector<36x128xf32> to vector<32x128xf32>
    %36 = tpu.concatenate %33, %34, %35 in 1 : vector<32x128xf32>, vector<32x128xf32>, vector<32x128xf32> -> vector<32x384xf32>
    %c0_16 = arith.constant 0 : index
    %c0_17 = arith.constant 0 : index
    %37 = vector.load %arg3[%c0_16, %c0_17] : memref<384x128xf32, #tpu.memory_space<vmem>>, vector<384x128xf32>
    %cst_18 = arith.constant dense<0.000000e+00> : vector<32x128xf32>
    %38 = tpu.matmul %36, %37, %cst_18 {dimension_numbers = #tpu.dot_dimension_numbers<[1], [0], [0], [1], [0, 0, 1, 1], [], []>} : vector<32x384xf32>, vector<384x128xf32>, vector<32x128xf32> -> vector<32x128xf32>
    %cst_19 = arith.constant dense<0.000000e+00> : vector<128xf32>
    %39 = vector.multi_reduction <add>, %38, %cst_19 [0] : vector<32x128xf32> to vector<128xf32>
    %40 = vector.shape_cast %39 : vector<128xf32> to vector<1x128xf32>
    %41 = arith.mulf %38, %38 : vector<32x128xf32>
    %cst_20 = arith.constant dense<0.000000e+00> : vector<128xf32>
    %42 = vector.multi_reduction <add>, %41, %cst_20 [0] : vector<32x128xf32> to vector<128xf32>
    %43 = vector.shape_cast %42 : vector<128xf32> to vector<1x128xf32>
    %44 = tpu.concatenate %40, %43 in 0 : vector<1x128xf32>, vector<1x128xf32> -> vector<2x128xf32>
    %c0_21 = arith.constant 0 : index
    %c0_22 = arith.constant 0 : index
    %45 = vector.load %arg9[%c0_21, %c0_22] : memref<128x128xf32, #tpu.memory_space<vmem>>, vector<128x128xf32>
    %cst_23 = arith.constant dense<0.000000e+00> : vector<2x128xf32>
    %46 = tpu.matmul %44, %45, %cst_23 {dimension_numbers = #tpu.dot_dimension_numbers<[1], [0], [0], [1], [0, 0, 1, 1], [], []>} : vector<2x128xf32>, vector<128x128xf32>, vector<2x128xf32> -> vector<2x128xf32>
    %cst_24 = arith.constant 0.001953125 : f32
    %47 = vector.broadcast %cst_24 : f32 to vector<2x128xf32>
    %48 = arith.mulf %46, %47 : vector<2x128xf32>
    %49 = vector.extract_strided_slice %48 {offsets = [0, 0], sizes = [1, 128], strides = [1, 1]} : vector<2x128xf32> to vector<1x128xf32>
    %50 = vector.extract_strided_slice %48 {offsets = [1, 0], sizes = [1, 128], strides = [1, 1]} : vector<2x128xf32> to vector<1x128xf32>
    %51 = arith.mulf %49, %49 : vector<1x128xf32>
    %52 = arith.subf %50, %51 : vector<1x128xf32>
    %c0_25 = arith.constant 0 : index
    %c0_26 = arith.constant 0 : index
    %53 = vector.load %arg6[%c0_25, %c0_26] : memref<1x128xf32, #tpu.memory_space<vmem>>, vector<1x128xf32>
    %cst_27 = arith.constant 9.99999974E-6 : f32
    %54 = vector.broadcast %cst_27 : f32 to vector<1x128xf32>
    %55 = arith.addf %52, %54 : vector<1x128xf32>
    %56 = math.rsqrt %55 : vector<1x128xf32>
    %57 = arith.mulf %53, %56 : vector<1x128xf32>
    %c0_28 = arith.constant 0 : index
    %c0_29 = arith.constant 0 : index
    %58 = vector.load %arg7[%c0_28, %c0_29] : memref<1x128xf32, #tpu.memory_space<vmem>>, vector<1x128xf32>
    %59 = arith.mulf %49, %57 : vector<1x128xf32>
    %60 = arith.subf %58, %59 : vector<1x128xf32>
    %61 = vector.broadcast %57 : vector<1x128xf32> to vector<32x128xf32>
    %62 = arith.mulf %38, %61 : vector<32x128xf32>
    %63 = vector.broadcast %60 : vector<1x128xf32> to vector<32x128xf32>
    %64 = arith.addf %62, %63 : vector<32x128xf32>
    %cst_30 = arith.constant 0.000000e+00 : f32
    %65 = vector.broadcast %cst_30 : f32 to vector<32x128xf32>
    %66 = arith.maximumf %64, %65 : vector<32x128xf32>
    %c0_31 = arith.constant 0 : index
    %c0_32 = arith.constant 0 : index
    %67 = vector.load %arg10[%c0_31, %c0_32] : memref<32x128xf32, #tpu.memory_space<vmem>>, vector<32x128xf32>
    tpu.vector_store %arg10[%c0_31, %c0_32], %66 {strides = array<i32>} : memref<32x128xf32, #tpu.memory_space<vmem>>, vector<32x128xf32>,
    return
  }
  func.func @transform_0(%arg0: i32) -> (i32, i32) {
    %c0_i32 = arith.constant 0 : i32
    %c0_i32_0 = arith.constant 0 : i32
    %c0_i32_1 = arith.constant 0 : i32
    return %c0_i32, %c0_i32_0 : i32, i32
  }
  func.func @transform_1(%arg0: i32) -> (i32, i32) {
    %c0_i32 = arith.constant 0 : i32
    %c0_i32_0 = arith.constant 0 : i32
    %c0_i32_1 = arith.constant 0 : i32
    return %c0_i32, %c0_i32_0 : i32, i32
  }
  func.func @transform_2(%arg0: i32) -> (i32, i32) {
    %c0_i32 = arith.constant 0 : i32
    %c0_i32_0 = arith.constant 0 : i32
    %c0_i32_1 = arith.constant 0 : i32
    return %c0_i32, %c0_i32_0 : i32, i32
  }
  func.func @transform_3(%arg0: i32) -> (i32, i32) {
    %c0_i32 = arith.constant 0 : i32
    %c0_i32_0 = arith.constant 0 : i32
    %c0_i32_1 = arith.constant 0 : i32
    return %c0_i32, %c0_i32_0 : i32, i32
  }
  func.func @transform_4(%arg0: i32) -> (i32, i32) {
    %c0_i32 = arith.constant 0 : i32
    %c0_i32_0 = arith.constant 0 : i32
    %c0_i32_1 = arith.constant 0 : i32
    return %c0_i32, %c0_i32_0 : i32, i32
  }
  func.func @transform_5(%arg0: i32) -> (i32, i32) {
    %c0_i32 = arith.constant 0 : i32
    %c0_i32_0 = arith.constant 0 : i32
    %c0_i32_1 = arith.constant 0 : i32
    return %c0_i32, %c0_i32_0 : i32, i32
  }
  func.func @transform_6(%arg0: i32) -> (i32, i32) {
    %c0_i32 = arith.constant 0 : i32
    %c0_i32_0 = arith.constant 0 : i32
    %c0_i32_1 = arith.constant 0 : i32
    return %c0_i32, %c0_i32_0 : i32, i32
  }
  func.func @transform_7(%arg0: i32) -> (i32, i32) {
    %c0_i32 = arith.constant 0 : i32
    %c0_i32_0 = arith.constant 0 : i32
    %c0_i32_1 = arith.constant 0 : i32
    return %c0_i32, %c0_i32_0 : i32, i32
  }
  func.func @transform_8(%arg0: i32) -> (i32, i32) {
    %c0_i32 = arith.constant 0 : i32
    %c0_i32_0 = arith.constant 0 : i32
    %c0_i32_1 = arith.constant 0 : i32
    return %c0_i32, %c0_i32_0 : i32, i32
  }
  func.func @transform_9(%arg0: i32) -> (i32, i32) {
    %c0_i32 = arith.constant 0 : i32
    %c0_i32_0 = arith.constant 0 : i32
    %c0_i32_1 = arith.constant 0 : i32
    return %c0_i32, %c0_i32_0 : i32, i32
  }
}

</mosaic_0001>

<bundles_post_ra>
// kernel: tpu_custom_call.1
= control target key start
LH: loop header
LB: loop body
LE: loop exit
PB: predicated region body
PF: predicated region fallthrough
CT: control target
= control target key end

     0   :  { %14 = vsyncpa [#allocation3], 0  ;;  %s1429_s0 = inlined_call_operand.hbm [shape: f32[32,192], index: 0, kind: input, shape index: {}]   ;;  %s1430_s1 = inlined_call_operand.hbm [shape: f32[192,128], index: 1, kind: input, shape index: {}]   ;;  %s1431_s2 = inlined_call_operand.hbm [shape: f32[384,128], index: 2, kind: input, shape index: {}]   ;;  %s1432_s3 = inlined_call_operand.vmem [shape: f32[1,128], index: 3, kind: input, shape index: {}]   ;;  %s1433_s4 = inlined_call_operand.vmem [shape: f32[1,128], index: 4, kind: input, shape index: {}]   ;;  %s1434_s5 = inlined_call_operand.vmem [shape: f32[1,128], index: 5, kind: input, shape index: {}]   ;;  %s1435_s6 = inlined_call_operand.vmem [shape: f32[1,128], index: 6, kind: input, shape index: {}]   ;;  %s1436_s7 = inlined_call_operand.hbm [shape: f32[128,128], index: 7, kind: input, shape index: {}]   ;;  %s1437_s8 = inlined_call_operand.hbm [shape: f32[128,128], index: 8, kind: input, shape index: {}]   ;;  %s1438_s9 = inlined_call_operand.hbm [shape: f32[32,128], index: 9, kind: output, shape index: {}]  }
   0x1   :  { %15 = vsyncpa [#allocation6], 0 }
   0x2   :  { %16 = vsyncpa [#allocation9], 0 }
   0x3   :  { %17 = vsyncpa [#allocation4], 0  ;;  %s1205_s30 = smov [#allocation5]  }
   0x4   :  { %s35_s10 = sshll.u32 %s1205_s30, 4  ;;  %s36_s10 = int_to_ptr.vmem [resolvable:$true] %s35_s10 }
   0x5   :  { %s1085_s11 = scalar_lea.vmem %s36_s10, 3072  ;;  %p1090_p1 = scmp.lt.s32.totalorder %s36_s10, %s36_s10 }
   0x6   :  { %p1086_p0 = scmp.ne.s32.totalorder %s36_s10, %s1085_s11  ;;  %p1091_p2 = scmp.lt.s32.totalorder %s1085_s11, %s1085_s11 }
   0x8   :  { %p1092_p3 = por %p1091_p2, %p1090_p1 }
   0xa   :  { %p1093_p4 = pnand %p1092_p3, %p1086_p0 }
   0xc   :  { %1096 = shalt.err (!%p1093_p4)
}
   0xd   :  { %s1206_s12 = smov 128   ;;  %s1207_s13 = smov 8  }
   0xe   :  { %41 = dma.hbm_to_vmem [thread:$0]  %s1430_s1, 3072, %s36_s10, [#allocation6], %s1206_s12, %s1206_s12, %s1207_s13  }
   0xf   :  { %s1208_s16 = smov [#allocation8]   ;;  %s1209_s18 = smov [#allocation2]  }
  0x10   :  { %s67_s17 = sshll.u32 %s1208_s16, 4  ;;  %s23_s19 = sshll.u32 %s1209_s18, 4  ;;  %s68_s17 = int_to_ptr.vmem [resolvable:$true] %s67_s17  ;;  %s24_s19 = int_to_ptr.vmem [resolvable:$true] %s23_s19 }
  0x11   :  { %s1105_s20 = scalar_lea.vmem %s68_s17, 2048  ;;  %p1110_p6 = scmp.lt.s32.totalorder %s68_s17, %s68_s17 }
  0x12   :  { %p1106_p5 = scmp.ne.s32.totalorder %s68_s17, %s1105_s20  ;;  %p1111_p7 = scmp.lt.s32.totalorder %s1105_s20, %s1105_s20 }
  0x14   :  { %p1112_p8 = por %p1111_p7, %p1110_p6 }
  0x16   :  { %p1113_p9 = pnand %p1112_p8, %p1106_p5 }
  0x18   :  { %1116 = shalt.err (!%p1113_p9)
}
  0x19   :  { %73 = dma.hbm_to_vmem [thread:$0]  %s1436_s7, 2048, %s68_s17, [#allocation9], %s1206_s12, %s1206_s12, %s1207_s13  }
  0x1a   :  { %s1125_s1 = scalar_lea.vmem %s24_s19, 1024  ;;  %p1130_p11 = scmp.lt.s32.totalorder %s24_s19, %s24_s19 }
  0x1b   :  { %p1126_p10 = scmp.ne.s32.totalorder %s24_s19, %s1125_s1  ;;  %p1131_p12 = scmp.lt.s32.totalorder %s1125_s1, %s1125_s1 }
  0x1d   :  { %p1132_p13 = por %p1131_p12, %p1130_p11 }
  0x1f   :  { %p1133_p0 = pnand %p1132_p13, %p1126_p10 }
  0x21   :  { %1136 = shalt.err (!%p1133_p0)
}
  0x22   :  { %s1210_s23 = smov 256   ;;  %s1211_s24 = smov 16  }
  0x23   :  { %29 = dma.hbm_to_vmem [thread:$0]  %s1429_s0, 1024, %s24_s19, [#allocation3], %s1210_s23, %s1210_s23, %s1211_s24  }
  0x24   :  { %s1212_s27 = smov [#allocation7]   ;;  %s1213_s29 = smov [#allocation10]  }
  0x25   :  { %s47_s28 = sshll.u32 %s1212_s27, 4  ;;  %s79_s30 = sshll.u32 %s1213_s29, 4  ;;  %s48_s28 = int_to_ptr.vmem [resolvable:$true] %s47_s28  ;;  %s80_s30 = int_to_ptr.vmem [resolvable:$true] %s79_s30 }
  0x26   :  { %s1145_s7 = scalar_lea.vmem %s48_s28, 6144  ;;  %p1150_p2 = scmp.lt.s32.totalorder %s48_s28, %s48_s28 }
  0x27   :  { %p1146_p1 = scmp.ne.s32.totalorder %s48_s28, %s1145_s7  ;;  %p1151_p3 = scmp.lt.s32.totalorder %s1145_s7, %s1145_s7 }
  0x29   :  { %p1152_p4 = por %p1151_p3, %p1150_p2 }
  0x2b   :  { %p1153_p5 = pnand %p1152_p4, %p1146_p1 }
  0x2d   :  { %1156 = shalt.err (!%p1153_p5)
}
  0x2e   :  { %53 = dma.hbm_to_vmem [thread:$0]  %s1431_s2, 6144, %s48_s28, [#allocation6], %s1206_s12, %s1206_s12, %s1207_s13  }
  0x2f   :  { %s1165_s0 = scalar_lea.vmem %s80_s30, 2048  ;;  %p1170_p7 = scmp.lt.s32.totalorder %s80_s30, %s80_s30 }
  0x30   :  { %p1166_p6 = scmp.ne.s32.totalorder %s80_s30, %s1165_s0  ;;  %p1171_p8 = scmp.lt.s32.totalorder %s1165_s0, %s1165_s0 }
  0x32   :  { %p1172_p9 = por %p1171_p8, %p1170_p7 }
  0x34   :  { %p1173_p10 = pnand %p1172_p9, %p1166_p6 }
  0x36   :  { %1176 = shalt.err (!%p1173_p10)
}
  0x37   :  { %85 = dma.hbm_to_vmem [thread:$0]  %s1437_s8, 2048, %s80_s30, [#allocation9], %s1206_s12, %s1206_s12, %s1207_s13  }
  0x38   :  { %1197 = dma.done.wait [#allocation3], 1024  }
  0x39   :  { %1198 = vsyncadd [#allocation3], 4294966272 }
  0x3a   :  { %1199 = dma.done.wait [#allocation6], 9216  }
  0x3b   :  { %1200 = vsyncadd [#allocation6], 4294958080 }
  0x3c   :  { %1201 = dma.done.wait [#allocation9], 4096  }
  0x3d   :  { %1202 = vsyncadd [#allocation9], 4294963200  ;;  %v1214_v0 = vmov 0.0   ;;  %v124_v1 = vld [vmem:[#allocation5 + $0x78] sm:$0xff]  ;;  %v123_v2 = vld [vmem:[#allocation5 + $0x70] sm:$0xff]  ;;  %vm133_vm0 = vcmask 523264  }
  0x3e   :  { %146 = vmatprep.subr.mxu0 %v1214_v0  ;;  %952 = vmatprep.subr.mxu1 %v1214_v0  ;;  %v122_v3 = vld [vmem:[#allocation5 + $0x68] sm:$0xff]  ;;  %v121_v4 = vld [vmem:[#allocation5 + $0x60] sm:$0xff]  ;;  %v120_v5 = vld [vmem:[#allocation5 + $0x58] sm:$0xff]  ;;  %vm1215_vm1 = vmmov 0   ;;  %vm253_vm2 = vcmask 1040384   ;;  %vm399_vm3 = vcmask 1041408  }
  0x3f   :  { %147 = vmatpush1.msra.mxu0 %v124_v1  ;;  %v119_v6 = vld [vmem:[#allocation5 + $0x50] sm:$0xff]  ;;  %v102_v7 = vld [vmem:[#allocation2 + $0x8] sm:$0xff]  ;;  %v270_v9 = vld [vmem:[#allocation8 + $0x78] sm:$0xff]  ;;  %984 = vmatprep.mubr.msk.f32.mxu1 %vm1215_vm1, %v1214_v0  ;;  %vm416_vm4 = vcmask 1045504   ;;  %vm430_vm5 = vcmask 1043456   ;;  %s1217_s20 = smov [#allocation11]  }
  0x40   :  { %148 = vmatprep.subr.mxu0 %v1214_v0  ;;  %848 = vmatprep.mubr.msk.f32.mxu0 %vm133_vm0, %v102_v7  ;;  %v118_v8 = vld [vmem:[#allocation5 + $0x48] sm:$0xff]  ;;  %v117_v10 = vld [vmem:[#allocation5 + $0x40] sm:$0xff]  ;;  %v116_v11 = vld [vmem:[#allocation5 + $0x38] sm:$0xff]  ;;  %s834_s21 = sshll.u32 %s1217_s20, 4  ;;  %s835_s21 = int_to_ptr.vmem [resolvable:$true] %s834_s21 }
  0x41   :  { %149 = vmatpush1.msra.mxu0 %v123_v2  ;;  %953 = vmatpush3.msra.mxu1 %v270_v9  ;;  %v115_v12 = vld [vmem:[#allocation5 + $0x30] sm:$0xff]  ;;  %v114_v13 = vld [vmem:[#allocation5 + $0x28] sm:$0xff]  ;;  %v113_v14 = vld [vmem:[#allocation5 + $0x20] sm:$0xff]  ;;  %p1182_p12 = scmp.lt.s32.totalorder %s835_s21, %s835_s21 }
  0x42   :  { %150 = vmatprep.subr.mxu0 %v1214_v0  ;;  %954 = vmatprep.subr.mxu1 %v1214_v0  ;;  %v112_v15 = vld [vmem:[#allocation5 + $0x18] sm:$0xff]  ;;  %v111_v16 = vld [vmem:[#allocation5 + $0x10] sm:$0xff]  ;;  %v110_v17 = vld [vmem:[#allocation5 + $0x8] sm:$0xff] }
  0x43   :  { %151 = vmatpush1.msra.mxu0 %v122_v3  ;;  %v109_v18 = vld [vmem:[#allocation5] sm:$0xff]  ;;  %v132_v19 = vld [vmem:[#allocation5 + $0xb8] sm:$0xff]  ;;  %v131_v20 = vld [vmem:[#allocation5 + $0xb0] sm:$0xff] }
  0x44   :  { %152 = vmatprep.subr.mxu0 %v1214_v0  ;;  %v130_v21 = vld [vmem:[#allocation5 + $0xa8] sm:$0xff]  ;;  %v129_v22 = vld [vmem:[#allocation5 + $0xa0] sm:$0xff]  ;;  %v128_v23 = vld [vmem:[#allocation5 + $0x98] sm:$0xff] }
  0x45   :  { %153 = vmatpush1.msra.mxu0 %v121_v4  ;;  %v127_v24 = vld [vmem:[#allocation5 + $0x90] sm:$0xff]  ;;  %v126_v25 = vld [vmem:[#allocation5 + $0x88] sm:$0xff]  ;;  %v125_v26 = vld [vmem:[#allocation5 + $0x80] sm:$0xff] }
  0x46   :  { %154 = vmatprep.subr.mxu0 %v1214_v0  ;;  %v101_v27 = vld [vmem:[#allocation2] sm:$0xff]  ;;  %v104_v28 = vld [vmem:[#allocation2 + $0x18] sm:$0xff]  ;;  %v103_v29 = vld [vmem:[#allocation2 + $0x10] sm:$0xff] }
  0x47   :  { %155 = vmatpush1.msra.mxu0 %v120_v5  ;;  %v106_v30 = vld [vmem:[#allocation2 + $0x28] sm:$0xff]  ;;  %v105_v31 = vld [vmem:[#allocation2 + $0x20] sm:$0xff]  ;;  %v108_v32 = vld [vmem:[#allocation2 + $0x38] sm:$0xff] }
  0x48   :  { %156 = vmatprep.subr.mxu0 %v1214_v0  ;;  %v107_v33 = vld [vmem:[#allocation2 + $0x30] sm:$0xff]  ;;  %v268_v35 = vld [vmem:[#allocation8 + $0x68] sm:$0xff]  ;;  %v267_v36 = vld [vmem:[#allocation8 + $0x60] sm:$0xff] }
  0x49   :  { %157 = vmatpush1.msra.mxu0 %v119_v6  ;;  %v269_v34 = vld [vmem:[#allocation8 + $0x70] sm:$0xff]  ;;  %v266_v37 = vld [vmem:[#allocation8 + $0x58] sm:$0xff]  ;;  %v264_v39 = vld [vmem:[#allocation8 + $0x48] sm:$0xff] }
  0x4a   :  { %158 = vmatprep.subr.mxu0 %v1214_v0  ;;  %955 = vmatpush3.msra.mxu1 %v269_v34  ;;  %v265_v38 = vld [vmem:[#allocation8 + $0x50] sm:$0xff]  ;;  %v263_v40 = vld [vmem:[#allocation8 + $0x40] sm:$0xff]  ;;  %v262_v41 = vld [vmem:[#allocation8 + $0x38] sm:$0xff] }
  0x4b   :  { %159 = vmatpush1.msra.mxu0 %v118_v8  ;;  %956 = vmatprep.subr.mxu1 %v1214_v0  ;;  %v261_v42 = vld [vmem:[#allocation8 + $0x30] sm:$0xff]  ;;  %v260_v43 = vld [vmem:[#allocation8 + $0x28] sm:$0xff]  ;;  %v259_v44 = vld [vmem:[#allocation8 + $0x20] sm:$0xff] }
  0x4c   :  { %160 = vmatprep.subr.mxu0 %v1214_v0  ;;  %957 = vmatpush3.msra.mxu1 %v268_v35  ;;  %v258_v45 = vld [vmem:[#allocation8 + $0x18] sm:$0xff]  ;;  %v257_v46 = vld [vmem:[#allocation8 + $0x10] sm:$0xff]  ;;  %v256_v47 = vld [vmem:[#allocation8 + $0x8] sm:$0xff] }
  0x4d   :  { %161 = vmatpush1.msra.mxu0 %v117_v10  ;;  %958 = vmatprep.subr.mxu1 %v1214_v0  ;;  %v255_v48 = vld [vmem:[#allocation8] sm:$0xff]  ;;  %v454_v34 = vld [vmem:[#allocation7 + $0x50] sm:$0xff]  ;;  %v469_v35 = vld [vmem:[#allocation7 + $0xc8] sm:$0xff] }
  0x4e   :  { %162 = vmatprep.subr.mxu0 %v1214_v0  ;;  %959 = vmatpush3.msra.mxu1 %v267_v36  ;;  %v485_v36 = vld [vmem:[#allocation7 + $0x148] sm:$0xff]  ;;  %vm852_vm6 = vmneg %vm399_vm3 }
  0x4f   :  { %163 = vmatpush1.msra.mxu0 %v116_v11  ;;  %960 = vmatprep.subr.mxu1 %v1214_v0 }
  0x50   :  { %164 = vmatprep.subr.mxu0 %v1214_v0  ;;  %961 = vmatpush3.msra.mxu1 %v266_v37  ;;  %v453_v37 = vld [vmem:[#allocation7 + $0x48] sm:$0xff] }
  0x51   :  { %165 = vmatpush1.msra.mxu0 %v115_v12  ;;  %962 = vmatprep.subr.mxu1 %v1214_v0 }
  0x52   :  { %166 = vmatprep.subr.mxu0 %v1214_v0  ;;  %963 = vmatpush3.msra.mxu1 %v265_v38  ;;  %v468_v38 = vld [vmem:[#allocation7 + $0xc0] sm:$0xff] }
  0x53   :  { %167 = vmatpush1.msra.mxu0 %v114_v13  ;;  %964 = vmatprep.subr.mxu1 %v1214_v0 }
  0x54   :  { %168 = vmatprep.subr.mxu0 %v1214_v0  ;;  %965 = vmatpush3.msra.mxu1 %v264_v39  ;;  %v484_v39 = vld [vmem:[#allocation7 + $0x140] sm:$0xff] }
  0x55   :  { %169 = vmatpush1.msra.mxu0 %v113_v14  ;;  %966 = vmatprep.subr.mxu1 %v1214_v0 }
  0x56   :  { %170 = vmatprep.subr.mxu0 %v1214_v0  ;;  %967 = vmatpush3.msra.mxu1 %v263_v40  ;;  %v452_v40 = vld [vmem:[#allocation7 + $0x40] sm:$0xff] }
  0x57   :  { %171 = vmatpush1.msra.mxu0 %v112_v15  ;;  %968 = vmatprep.subr.mxu1 %v1214_v0 }
  0x58   :  { %172 = vmatprep.subr.mxu0 %v1214_v0  ;;  %969 = vmatpush3.msra.mxu1 %v262_v41  ;;  %v467_v41 = vld [vmem:[#allocation7 + $0xb8] sm:$0xff] }
  0x59   :  { %173 = vmatpush1.msra.mxu0 %v111_v16  ;;  %970 = vmatprep.subr.mxu1 %v1214_v0 }
  0x5a   :  { %174 = vmatprep.subr.mxu0 %v1214_v0  ;;  %971 = vmatpush3.msra.mxu1 %v261_v42  ;;  %v483_v42 = vld [vmem:[#allocation7 + $0x138] sm:$0xff] }
  0x5b   :  { %175 = vmatpush1.msra.mxu0 %v110_v17  ;;  %972 = vmatprep.subr.mxu1 %v1214_v0  ;;  %v475_v17 = vld [vmem:[#allocation7 + $0xf8] sm:$0xff] }
  0x5c   :  { %176 = vmatprep.subr.mxu0 %v1214_v0  ;;  %973 = vmatpush3.msra.mxu1 %v260_v43  ;;  %v451_v43 = vld [vmem:[#allocation7 + $0x38] sm:$0xff] }
  0x5d   :  { %177 = vmatpush1.msra.mxu0 %v109_v18  ;;  %974 = vmatprep.subr.mxu1 %v1214_v0  ;;  %v491_v18 = vld [vmem:[#allocation7 + $0x178] sm:$0xff] }
  0x5e   :  { %194 = vmatprep.subr.mxu0 %v1214_v0  ;;  %975 = vmatpush3.msra.mxu1 %v259_v44  ;;  %v466_v44 = vld [vmem:[#allocation7 + $0xb0] sm:$0xff] }
  0x5f   :  { %195 = vmatpush2.msra.mxu0 %v132_v19  ;;  %976 = vmatprep.subr.mxu1 %v1214_v0  ;;  %v459_v19 = vld [vmem:[#allocation7 + $0x78] sm:$0xff] }
  0x60   :  { %196 = vmatprep.subr.mxu0 %v1214_v0  ;;  %977 = vmatpush3.msra.mxu1 %v258_v45  ;;  %v482_v45 = vld [vmem:[#allocation7 + $0x130] sm:$0xff] }
  0x61   :  { %197 = vmatpush2.msra.mxu0 %v131_v20  ;;  %978 = vmatprep.subr.mxu1 %v1214_v0  ;;  %v474_v20 = vld [vmem:[#allocation7 + $0xf0] sm:$0xff] }
  0x62   :  { %198 = vmatprep.subr.mxu0 %v1214_v0  ;;  %979 = vmatpush3.msra.mxu1 %v257_v46  ;;  %v450_v46 = vld [vmem:[#allocation7 + $0x30] sm:$0xff] }
  0x63   :  { %199 = vmatpush2.msra.mxu0 %v130_v21  ;;  %980 = vmatprep.subr.mxu1 %v1214_v0  ;;  %v490_v21 = vld [vmem:[#allocation7 + $0x170] sm:$0xff] }
  0x64   :  { %200 = vmatprep.subr.mxu0 %v1214_v0  ;;  %981 = vmatpush3.msra.mxu1 %v256_v47  ;;  %v465_v47 = vld [vmem:[#allocation7 + $0xa8] sm:$0xff] }
  0x65   :  { %201 = vmatpush2.msra.mxu0 %v129_v22  ;;  %982 = vmatprep.subr.mxu1 %v1214_v0  ;;  %v458_v22 = vld [vmem:[#allocation7 + $0x70] sm:$0xff] }
  0x66   :  { %202 = vmatprep.subr.mxu0 %v1214_v0  ;;  %983 = vmatpush3.msra.mxu1 %v255_v48  ;;  %v481_v48 = vld [vmem:[#allocation7 + $0x128] sm:$0xff] }
  0x67   :  { %203 = vmatpush2.msra.mxu0 %v128_v23  ;;  %871 = vmatprep.subr.mxu1 %v475_v17  ;;  %v473_v23 = vld [vmem:[#allocation7 + $0xe8] sm:$0xff] }
  0x68   :  { %204 = vmatprep.subr.mxu0 %v1214_v0 }
  0x69   :  { %205 = vmatpush2.msra.mxu0 %v127_v24  ;;  %v489_v24 = vld [vmem:[#allocation7 + $0x168] sm:$0xff] }
  0x6a   :  { %206 = vmatprep.subr.mxu0 %v1214_v0 }
  0x6b   :  { %207 = vmatpush2.msra.mxu0 %v126_v25  ;;  %v457_v25 = vld [vmem:[#allocation7 + $0x68] sm:$0xff] }
  0x6c   :  { %208 = vmatprep.subr.mxu0 %v1214_v0 }
  0x6d   :  { %209 = vmatpush2.msra.mxu0 %v125_v26  ;;  %v472_v26 = vld [vmem:[#allocation7 + $0xe0] sm:$0xff] }
  0x6e   :  { %211 = vmatmul.mubr.f32.vlgmr.msra.gmra.mxu0 %v101_v27  ;;  %987 = vmatprep.subr.mxu0 %v491_v18  ;;  %v488_v27 = vld [vmem:[#allocation7 + $0x160] sm:$0xff] }
  0x6f   :  { %849 = vmatprep.mubr.msk.f32.mxu0 %vm133_vm0, %v104_v28  ;;  %988 = vmatpush3.msra.mxu0 %v491_v18  ;;  %v456_v28 = vld [vmem:[#allocation7 + $0x60] sm:$0xff] }
  0x70   :  { %989 = vmatprep.subr.mxu0 %v490_v21 }
  0x71   :  { %990 = vmatpush3.msra.mxu0 %v490_v21 }
  0x72   :  { %216 = vmatmul.mubr.f32.gmra.mxu0 %v103_v29  ;;  %991 = vmatprep.subr.mxu0 %v489_v24  ;;  %v471_v29 = vld [vmem:[#allocation7 + $0xd8] sm:$0xff] }
  0x73   :  { %850 = vmatprep.mubr.msk.f32.mxu0 %vm133_vm0, %v106_v30  ;;  %992 = vmatpush3.msra.mxu0 %v489_v24  ;;  %v487_v30 = vld [vmem:[#allocation7 + $0x158] sm:$0xff] }
  0x74   :  { %993 = vmatprep.subr.mxu0 %v488_v27 }
  0x75   :  { %994 = vmatpush3.msra.mxu0 %v488_v27 }
  0x76   :  { %221 = vmatmul.mubr.f32.gmra.mxu0 %v105_v31  ;;  %995 = vmatprep.subr.mxu0 %v487_v30  ;;  %v455_v31 = vld [vmem:[#allocation7 + $0x58] sm:$0xff] }
  0x77   :  { %851 = vmatprep.mubr.msk.f32.mxu0 %vm133_vm0, %v108_v32  ;;  %996 = vmatpush3.msra.mxu0 %v487_v30  ;;  %v470_v32 = vld [vmem:[#allocation7 + $0xd0] sm:$0xff] }
  0x7a   :  { %226 = vmatmul.mubr.f32.gmra.mxu0 %v107_v33  ;;  %v486_v33 = vld [vmem:[#allocation7 + $0x150] sm:$0xff] }
  0x7b   :  { %997 = vmatprep.subr.mxu0 %v486_v33 }
  0x7c   :  { %998 = vmatpush3.msra.mxu0 %v486_v33 }
  0x7d   :  { %999 = vmatprep.subr.mxu0 %v485_v36 }
  0x7e   :  { %1000 = vmatpush3.msra.mxu0 %v485_v36 }
  0x7f   :  { %1001 = vmatprep.subr.mxu0 %v484_v39 }
  0x80   :  { %1002 = vmatpush3.msra.mxu0 %v484_v39 }
  0x81   :  { %1003 = vmatprep.subr.mxu0 %v483_v42 }
  0x82   :  { %1004 = vmatpush3.msra.mxu0 %v483_v42 }
  0x83   :  { %1005 = vmatprep.subr.mxu0 %v482_v45 }
  0x84   :  { %1006 = vmatpush3.msra.mxu0 %v482_v45 }
  0x85   :  { %1007 = vmatprep.subr.mxu0 %v481_v48 }
  0x86   :  { %1008 = vmatpush3.msra.mxu0 %v481_v48 }
 0x12e   :  { %v1341_v49 = vpop.f32.mrf.mxu0 }
 0x12f   :  { %v240_v55 = vmul.f32 %v1341_v49, %v1341_v49 }
 0x130   :  { %v214_v50 = vpop.f32.mrf.mxu0 }
 0x131   :  { %v449_v50 = vld [vmem:[#allocation7 + $0x28] sm:$0xff] }
 0x132   :  { %v1343_v51 = vpop.f32.mrf.mxu0 }
 0x133   :  { %v241_v53 = vmul.f32 %v1343_v51, %v1343_v51  ;;  %v231_v56 = vadd.f32 %v1343_v51, %v1341_v49 }
 0x134   :  { %v219_v52 = vpop.f32.mrf.mxu0 }
 0x135   :  { %v244_v59 = vadd.f32 %v241_v53, %v240_v55  ;;  %v464_v52 = vld [vmem:[#allocation7 + $0xa0] sm:$0xff] }
 0x136   :  { %v1347_v54 = vpop.f32.mrf.mxu0  ;;  %v480_v53 = vld [vmem:[#allocation7 + $0x120] sm:$0xff] }
 0x137   :  { %v242_v57 = vmul.f32 %v1347_v54, %v1347_v54  ;;  %v232_v60 = vadd.f32 %v231_v56, %v1347_v54  ;;  %v448_v55 = vld [vmem:[#allocation7 + $0x20] sm:$0xff]  ;;  %1009 = vmatprep.subr.mxu0 %v480_v53  ;;  %v463_v56 = vld [vmem:[#allocation7 + $0x98] sm:$0xff] }
 0x138   :  { %v224_v58 = vpop.f32.mrf.mxu0  ;;  %1010 = vmatpush3.msra.mxu0 %v480_v53 }
 0x139   :  { %v245_v62 = vadd.f32 %v244_v59, %v242_v57  ;;  %v479_v57 = vld [vmem:[#allocation7 + $0x118] sm:$0xff]  ;;  %v462_v59 = vld [vmem:[#allocation7 + $0x90] sm:$0xff] }
 0x13a   :  { %v1356_v61 = vpop.f32.mrf.mxu0  ;;  %v447_v58 = vld [vmem:[#allocation7 + $0x18] sm:$0xff]  ;;  %1011 = vmatprep.subr.mxu0 %v479_v57 }
 0x13b   :  { %v233_v63 = vadd.f32 %v232_v60, %v1356_v61  ;;  %v243_v1 = vmul.f32 %v1356_v61, %v1356_v61  ;;  %v478_v60 = vld [vmem:[#allocation7 + $0x110] sm:$0xff]  ;;  %1012 = vmatpush3.msra.mxu0 %v479_v57 }
 0x13c   :  { %v229_v2 = vpop.f32.mrf.mxu0  ;;  %1013 = vmatprep.subr.mxu0 %v478_v60 }
 0x13d   :  { %v234_v3 = vrot.slane %v233_v63, 4  ;;  %v246_v4 = vadd.f32 %v245_v62, %v243_v1  ;;  %v446_v62 = vld [vmem:[#allocation7 + $0x10] sm:$0xff]  ;;  %v477_v1 = vld [vmem:[#allocation7 + $0x108] sm:$0xff]  ;;  %1014 = vmatpush3.msra.mxu0 %v478_v60 }
 0x13e   :  { %v445_v2 = vld [vmem:[#allocation7 + $0x8] sm:$0xff]  ;;  %1015 = vmatprep.subr.mxu0 %v477_v1 }
 0x13f   :  { %v235_v5 = vadd.f32 %v234_v3, %v233_v63  ;;  %v247_v6 = vrot.slane %v246_v4, 4  ;;  %v461_v63 = vld [vmem:[#allocation7 + $0x88] sm:$0xff]  ;;  %v460_v3 = vld [vmem:[#allocation7 + $0x80] sm:$0xff]  ;;  %1016 = vmatpush3.msra.mxu0 %v477_v1 }
 0x141   :  { %v236_v7 = vrot.slane %v235_v5, 2  ;;  %v248_v8 = vadd.f32 %v247_v6, %v246_v4  ;;  %v476_v4 = vld [vmem:[#allocation7 + $0x100] sm:$0xff] }
 0x142   :  { %1017 = vmatprep.subr.mxu0 %v476_v4 }
 0x143   :  { %v237_v9 = vadd.f32 %v236_v7, %v235_v5  ;;  %v249_v10 = vrot.slane %v248_v8, 2  ;;  %v444_v5 = vld [vmem:[#allocation7] sm:$0xff]  ;;  %1018 = vmatpush3.msra.mxu0 %v476_v4 }
 0x145   :  { %v238_v11 = vrot.slane %v237_v9, 1  ;;  %v250_v12 = vadd.f32 %v249_v10, %v248_v8 }
 0x147   :  { %v251_v13 = vrot.slane %v250_v12, 1  ;;  %v239_v14 = vadd.f32 %v238_v11, %v237_v9 }
 0x149   :  { %v252_v15 = vadd.f32 %v251_v13, %v250_v12  ;;  %v1216_v13 = vmov 1966171168  }
 0x14b   :  { %v254_v16 = vsel %vm253_vm2, %v239_v14, %v252_v15  ;;  %v352_v14 = vunpack.c.l.s4 %v1216_v13  ;;  %v354_v15 = vlaneseq  ;;  %v694_v13 = vld [vmem:[#allocation10 + $0x48] sm:$0xff] }
 0x14c   :  { %985 = vmatmul.mubr.f32.vlgmr.msra.gmra.mxu1 %v254_v16 }
 0x14d   :  { %872 = vmatpush3.msra.mxu1 %v459_v19  ;;  %v353_v16 = vunpack.c.0.s8 %v352_v14  ;;  %v355_v17 = vshrl.u32 %v354_v15, 7  ;;  %v693_v14 = vld [vmem:[#allocation10 + $0x40] sm:$0xff]  ;;  %v692_v15 = vld [vmem:[#allocation10 + $0x38] sm:$0xff] }
 0x14e   :  { %873 = vmatprep.subr.mxu1 %v474_v20 }
 0x14f   :  { %874 = vmatpush3.msra.mxu1 %v458_v22  ;;  %v1363_v18 = vsub.s32 %v353_v16, %v355_v17  ;;  %v347_v22 = vld [vmem:[%s1432_s3] sm:$0x1]  ;;  %v1370_v24 = vsub.s32 0, %v355_v17  ;;  %v691_v16 = vld [vmem:[#allocation10 + $0x30] sm:$0xff]  ;;  %v690_v17 = vld [vmem:[#allocation10 + $0x28] sm:$0xff] }
 0x150   :  { %875 = vmatprep.subr.mxu1 %v473_v23 }
 0x151   :  { %876 = vmatpush3.msra.mxu1 %v457_v25 }
 0x152   :  { %877 = vmatprep.subr.mxu1 %v472_v26  ;;  %v368_v26 = vld [vmem:[%s1433_s4] sm:$0x1] }
 0x153   :  { %878 = vmatpush3.msra.mxu1 %v456_v28 }
 0x154   :  { %879 = vmatprep.subr.mxu1 %v471_v29 }
 0x155   :  { %880 = vmatpush3.msra.mxu1 %v455_v31 }
 0x156   :  { %881 = vmatprep.subr.mxu1 %v470_v32 }
 0x157   :  { %882 = vmatpush3.msra.mxu1 %v454_v34 }
 0x158   :  { %883 = vmatprep.subr.mxu1 %v469_v35 }
 0x159   :  { %884 = vmatpush3.msra.mxu1 %v453_v37 }
 0x15a   :  { %885 = vmatprep.subr.mxu1 %v468_v38 }
 0x15b   :  { %886 = vmatpush3.msra.mxu1 %v452_v40 }
 0x15c   :  { %887 = vmatprep.subr.mxu1 %v467_v41 }
 0x15d   :  { %888 = vmatpush3.msra.mxu1 %v451_v43 }
 0x15e   :  { %889 = vmatprep.subr.mxu1 %v466_v44 }
 0x15f   :  { %890 = vmatpush3.msra.mxu1 %v450_v46 }
 0x160   :  { %891 = vmatprep.subr.mxu1 %v465_v47 }
 0x161   :  { %892 = vmatpush3.msra.mxu1 %v449_v50 }
 0x162   :  { %893 = vmatprep.subr.mxu1 %v464_v52 }
 0x163   :  { %894 = vmatpush3.msra.mxu1 %v448_v55 }
 0x164   :  { %895 = vmatprep.subr.mxu1 %v463_v56 }
 0x165   :  { %896 = vmatpush3.msra.mxu1 %v447_v58 }
 0x166   :  { %897 = vmatprep.subr.mxu1 %v462_v59 }
 0x167   :  { %898 = vmatpush3.msra.mxu1 %v446_v62 }
 0x168   :  { %899 = vmatprep.subr.mxu1 %v461_v63 }
 0x169   :  { %900 = vmatpush3.msra.mxu1 %v445_v2 }
 0x16a   :  { %901 = vmatprep.subr.mxu1 %v460_v3 }
 0x16b   :  { %902 = vmatpush3.msra.mxu1 %v444_v5 }
 0x16c   :  { %1025 = vmatprep.subr.mxu1 %v1214_v0 }
 0x20c   :  { %v337_v6 = vpop.f32.mrf.mxu1 }
 0x20d   :  { %v341_v7 = vmul.f32 0.001953125, %v337_v6 }
 0x20e   :  { %v986_v8 = vpop.f32.mrf.mxu1 }
 0x20f   :  { %v342_v9 = vmul.f32 %v341_v7, %v341_v7  ;;  %v699_v8 = vld [vmem:[#allocation10 + $0x70] sm:$0xff] }
 0x211   :  { %v344_v10 = vrot.slane %v342_v9, 7  ;;  %v698_v9 = vld [vmem:[#allocation10 + $0x68] sm:$0xff] }
 0x213   :  { %v346_v11 = vsub.f32 %v341_v7, %v344_v10  ;;  %v697_v10 = vld [vmem:[#allocation10 + $0x60] sm:$0xff] }
 0x215   :  { %v348_v12 = vadd.f32 1e-05, %v346_v11  ;;  %v696_v11 = vld [vmem:[#allocation10 + $0x58] sm:$0xff] }
 0x217   :  { %1073 = vrsqrt.f32 %v348_v12  ;;  %v695_v12 = vld [vmem:[#allocation10 + $0x50] sm:$0xff] }
 0x224   :  { %v1074_v19 = vpop.eup %1073 }
 0x225   :  { %v357_v20 = vrot.slane %v1074_v19, %v1363_v18  ;;  %v689_v19 = vld [vmem:[#allocation10 + $0x20] sm:$0xff] }
 0x227   :  { %v358_v21 = vcombine.high %v357_v20, %v357_v20  ;;  %v688_v20 = vld [vmem:[#allocation10 + $0x18] sm:$0xff] }
 0x229   :  { %v365_v23 = vrot.slane %v358_v21, %v1363_v18  ;;  %v687_v21 = vld [vmem:[#allocation10 + $0x10] sm:$0xff] }
 0x22b   :  { %v367_v25 = vmul.f32 %v365_v23, %v347_v22  ;;  %v686_v22 = vld [vmem:[#allocation10 + $0x8] sm:$0xff]  ;;  %v685_v23 = vld [vmem:[#allocation10] sm:$0xff] }
 0x22d   :  { %v369_v27 = vmul.f32 %v367_v25, %v341_v7  ;;  %v375_v28 = vrot.slane %v367_v25, %v1370_v24  ;;  %v700_v7 = vld [vmem:[#allocation10 + $0x78] sm:$0xff] }
 0x22f   :  { %v370_v29 = vsub.f32 %v368_v26, %v369_v27  ;;  %v379_v30 = vmul.f32 %v375_v28, %v1347_v54  ;;  %v377_v32 = vmul.f32 %v375_v28, %v1341_v49  ;;  %v378_v33 = vmul.f32 %v375_v28, %v1343_v51 }
 0x230   :  { %v380_v34 = vmul.f32 %v375_v28, %v1356_v61 }
 0x231   :  { %v385_v31 = vrot.slane %v370_v29, %v1370_v24 }
 0x233   :  { %v389_v35 = vadd.f32 %v385_v31, %v379_v30  ;;  %v387_v36 = vadd.f32 %v385_v31, %v377_v32  ;;  %v388_v37 = vadd.f32 %v385_v31, %v378_v33  ;;  %v390_v38 = vadd.f32 %v385_v31, %v380_v34 }
 0x235   :  { %v391_v39 = vmax.f32 %v387_v36, 0.0  ;;  %v392_v40 = vmax.f32 %v388_v37, 0.0  ;;  %v393_v41 = vmax.f32 %v389_v35, 0.0  ;;  %v394_v42 = vmax.f32 %v390_v38, 0.0 }
 0x237   :  { %v400_v43 = vrot.slane %v391_v39, 6  ;;  %v401_v44 = vrot.slane %v392_v40, 6  ;;  %v403_v54 = vrot.slane %v393_v41, 6  ;;  %v405_v45 = vrot.slane %v394_v42, 6 }
 0x239   :  { %v402_v49 = vsel %vm399_vm3, %v400_v43, %v401_v44  ;;  %v412_v51 = vsel %vm399_vm3, 0.0, %v400_v43  ;;  %v404_v61 = vsel %vm399_vm3, %v401_v44, %v403_v54  ;;  %v406_v46 = vsel %vm399_vm3, %v403_v54, %v405_v45 }
 0x23a   :  { %v417_v47 = vrot.slane %v412_v51, 2  ;;  %v418_v48 = vrot.slane %v402_v49, 2  ;;  %v431_v50 = vrot.slane %v412_v51, 4  ;;  %v432_v52 = vrot.slane %v402_v49, 4 }
 0x23b   :  { %v434_v53 = vrot.slane %v404_v61, 4  ;;  %v420_v55 = vrot.slane %v404_v61, 2  ;;  %v436_v56 = vrot.slane %v406_v46, 4  ;;  %v413_v57 = vsel %vm399_vm3, %v405_v45, 0.0 }
 0x23c   :  { %v419_v58 = vsel %vm416_vm4, %v417_v47, %v418_v48  ;;  %v433_v59 = vsel %vm430_vm5, %v431_v50, %v432_v52  ;;  %v438_v62 = vrot.slane %v413_v57, 4  ;;  %v422_v2 = vrot.slane %v406_v46, 2 }
 0x23d   :  { %556 = vmatprep.mubr.f32.mxu1 %v419_v58  ;;  %1019 = vmatprep.mubr.f32.mxu0 %v433_v59  ;;  %v435_v60 = vsel %vm430_vm5, %v432_v52, %v434_v53  ;;  %v421_v63 = vsel %vm416_vm4, %v418_v48, %v420_v55  ;;  %v437_v1 = vsel %vm430_vm5, %v434_v53, %v436_v56  ;;  %v424_v5 = vrot.slane %v413_v57, 2 }
 0x23e   :  { %853 = vmatmul.mubr.msk.f32.vlgmr.msra.gmra.mxu1 %vm852_vm6, %v400_v43  ;;  %1020 = vmatmul.mubr.f32.vlgmr.msra.gmra.mxu0 %v435_v60  ;;  %v439_v3 = vsel %vm430_vm5, %v436_v56, %v438_v62  ;;  %v423_v4 = vsel %vm416_vm4, %v420_v55, %v422_v2 }
 0x23f   :  { %561 = vmatprep.mubr.f32.mxu1 %v421_v63  ;;  %1022 = vmatprep.mubr.f32.mxu0 %v437_v1  ;;  %v425_v6 = vsel %vm416_vm4, %v422_v2, %v424_v5 }
 0x240   :  { %1026 = vmatpush3.msra.mxu1 %v700_v7 }
 0x241   :  { %1027 = vmatprep.subr.mxu1 %v1214_v0 }
 0x242   :  { %562 = vmatmul.mubr.f32.gmra.mxu1 %v402_v49  ;;  %1023 = vmatmul.mubr.f32.gmra.mxu0 %v439_v3 }
 0x243   :  { %566 = vmatprep.mubr.f32.mxu1 %v423_v4  ;;  %1028 = vmatpush3.msra.mxu1 %v699_v8 }
 0x244   :  { %1029 = vmatprep.subr.mxu1 %v1214_v0 }
 0x245   :  { %1030 = vmatpush3.msra.mxu1 %v698_v9 }
 0x246   :  { %567 = vmatmul.mubr.f32.gmra.mxu1 %v404_v61  ;;  %1031 = vmatprep.subr.mxu1 %v1214_v0 }
 0x247   :  { %571 = vmatprep.mubr.f32.mxu1 %v425_v6  ;;  %1032 = vmatpush3.msra.mxu1 %v697_v10 }
 0x248   :  { %1033 = vmatprep.subr.mxu1 %v1214_v0 }
 0x249   :  { %1034 = vmatpush3.msra.mxu1 %v696_v11 }
 0x24a   :  { %572 = vmatmul.mubr.f32.gmra.mxu1 %v406_v46  ;;  %1035 = vmatprep.subr.mxu1 %v1214_v0 }
 0x24b   :  { %1057 = vmatprep.mubr.msk.f32.mxu1 %vm1215_vm1, %v1214_v0  ;;  %1036 = vmatpush3.msra.mxu1 %v695_v12 }
 0x24c   :  { %1037 = vmatprep.subr.mxu1 %v1214_v0 }
 0x24d   :  { %1038 = vmatpush3.msra.mxu1 %v694_v13 }
 0x24e   :  { %1039 = vmatprep.subr.mxu1 %v1214_v0 }
 0x24f   :  { %1040 = vmatpush3.msra.mxu1 %v693_v14  ;;  %v777_v14 = vld [vmem:[%s1434_s5] sm:$0x1]  ;;  %s1177_s5 = scalar_lea.vmem %s835_s21, 512 }
 0x250   :  { %1041 = vmatprep.subr.mxu1 %v1214_v0  ;;  %p1178_p11 = scmp.ne.s32.totalorder %s835_s21, %s1177_s5  ;;  %p1183_p13 = scmp.lt.s32.totalorder %s1177_s5, %s1177_s5 }
 0x251   :  { %1042 = vmatpush3.msra.mxu1 %v692_v15 }
 0x252   :  { %1043 = vmatprep.subr.mxu1 %v1214_v0  ;;  %p1184_p0 = por %p1183_p13, %p1182_p12 }
 0x253   :  { %1044 = vmatpush3.msra.mxu1 %v691_v16 }
 0x254   :  { %1045 = vmatprep.subr.mxu1 %v1214_v0  ;;  %p1185_p1 = pnand %p1184_p0, %p1178_p11 }
 0x255   :  { %1046 = vmatpush3.msra.mxu1 %v690_v17  ;;  %v798_v17 = vld [vmem:[%s1435_s6] sm:$0x1] }
 0x256   :  { %1047 = vmatprep.subr.mxu1 %v1214_v0 }
 0x257   :  { %1048 = vmatpush3.msra.mxu1 %v689_v19 }
 0x258   :  { %1049 = vmatprep.subr.mxu1 %v1214_v0 }
 0x259   :  { %1050 = vmatpush3.msra.mxu1 %v688_v20 }
 0x25a   :  { %1051 = vmatprep.subr.mxu1 %v1214_v0 }
 0x25b   :  { %1052 = vmatpush3.msra.mxu1 %v687_v21 }
 0x25c   :  { %1053 = vmatprep.subr.mxu1 %v1214_v0 }
 0x25d   :  { %1054 = vmatpush3.msra.mxu1 %v686_v22 }
 0x25e   :  { %1055 = vmatprep.subr.mxu1 %v1214_v0 }
 0x25f   :  { %1056 = vmatpush3.msra.mxu1 %v685_v23 }
 0x2fe   :  { %v903_v25 = vpop.f32.mrf.mxu1  ;;  %v1021_v26 = vpop.f32.mrf.mxu0 }
 0x300   :  { %v904_v27 = vpop.f32.mrf.mxu1  ;;  %v643_v28 = vpop.f32.mrf.mxu0 }
 0x301   :  { %v905_v31 = vadd.f32 %v904_v27, %v903_v25 }
 0x302   :  { %v906_v29 = vpop.f32.mrf.mxu1  ;;  %v1024_v33 = vpop.f32.mrf.mxu0 }
 0x303   :  { %v644_v37 = vadd.f32 %v905_v31, %v643_v28 }
 0x304   :  { %v907_v30 = vpop.f32.mrf.mxu1  ;;  %v653_v39 = vpop.f32.mrf.mxu0 }
 0x305   :  { %v908_v32 = vadd.f32 %v907_v30, %v906_v29  ;;  %v671_v43 = vmul.f32 %v644_v37, %v644_v37 }
 0x306   :  { %v909_v34 = vpop.f32.mrf.mxu1 }
 0x307   :  { %v649_v35 = vadd.f32 %v1021_v26, %v908_v32 }
 0x308   :  { %v910_v36 = vpop.f32.mrf.mxu1 }
 0x309   :  { %v911_v38 = vadd.f32 %v910_v36, %v909_v34  ;;  %v672_v41 = vmul.f32 %v649_v35, %v649_v35  ;;  %v662_v44 = vadd.f32 %v649_v35, %v644_v37 }
 0x30a   :  { %v912_v40 = vpop.f32.mrf.mxu1 }
 0x30b   :  { %v654_v42 = vadd.f32 %v911_v38, %v653_v39  ;;  %v675_v49 = vadd.f32 %v672_v41, %v671_v43 }
 0x30c   :  { %v913_v0 = vpop.f32.mrf.mxu1 }
 0x30d   :  { %v673_v54 = vmul.f32 %v654_v42, %v654_v42  ;;  %v914_v45 = vadd.f32 %v913_v0, %v912_v40  ;;  %v663_v51 = vadd.f32 %v662_v44, %v654_v42 }
 0x30f   :  { %v659_v61 = vadd.f32 %v1024_v33, %v914_v45  ;;  %v676_v46 = vadd.f32 %v675_v49, %v673_v54 }
 0x311   :  { %v664_v47 = vadd.f32 %v663_v51, %v659_v61  ;;  %v674_v48 = vmul.f32 %v659_v61, %v659_v61 }
 0x313   :  { %v665_v50 = vrot.slane %v664_v47, 4  ;;  %v677_v52 = vadd.f32 %v676_v46, %v674_v48 }
 0x315   :  { %v666_v53 = vadd.f32 %v665_v50, %v664_v47  ;;  %v678_v55 = vrot.slane %v677_v52, 4 }
 0x317   :  { %v667_v56 = vrot.slane %v666_v53, 2  ;;  %v679_v57 = vadd.f32 %v678_v55, %v677_v52 }
 0x319   :  { %v668_v58 = vadd.f32 %v667_v56, %v666_v53  ;;  %v680_v59 = vrot.slane %v679_v57, 2 }
 0x31b   :  { %v669_v60 = vrot.slane %v668_v58, 1  ;;  %v681_v62 = vadd.f32 %v680_v59, %v679_v57 }
 0x31d   :  { %v682_v63 = vrot.slane %v681_v62, 1  ;;  %v670_v1 = vadd.f32 %v669_v60, %v668_v58 }
 0x31f   :  { %v683_v2 = vadd.f32 %v682_v63, %v681_v62 }
 0x321   :  { %v684_v3 = vsel %vm253_vm2, %v670_v1, %v683_v2 }
 0x322   :  { %1058 = vmatmul.mubr.f32.vlgmr.msra.gmra.mxu1 %v684_v3 }
 0x3e2   :  { %v767_v4 = vpop.f32.mrf.mxu1 }
 0x3e3   :  { %v771_v5 = vmul.f32 0.001953125, %v767_v4 }
 0x3e4   :  { %v1059_v6 = vpop.f32.mrf.mxu1 }
 0x3e5   :  { %v772_v7 = vmul.f32 %v771_v5, %v771_v5 }
 0x3e7   :  { %v774_v8 = vrot.slane %v772_v7, 7 }
 0x3e9   :  { %v776_v9 = vsub.f32 %v771_v5, %v774_v8 }
 0x3eb   :  { %v778_v10 = vadd.f32 1e-05, %v776_v9 }
 0x3ed   :  { %1075 = vrsqrt.f32 %v778_v10 }
 0x3fa   :  { %v1076_v11 = vpop.eup %1075 }
 0x3fb   :  { %v787_v12 = vrot.slane %v1076_v11, %v1363_v18 }
 0x3fd   :  { %v788_v13 = vcombine.high %v787_v12, %v787_v12 }
 0x3ff   :  { %v795_v15 = vrot.slane %v788_v13, %v1363_v18 }
 0x401   :  { %v797_v16 = vmul.f32 %v795_v15, %v777_v14 }
 0x403   :  { %v799_v19 = vmul.f32 %v797_v16, %v771_v5  ;;  %v805_v20 = vrot.slane %v797_v16, %v1370_v24 }
 0x405   :  { %v800_v21 = vsub.f32 %v798_v17, %v799_v19  ;;  %v807_v22 = vmul.f32 %v805_v20, %v644_v37  ;;  %v808_v25 = vmul.f32 %v805_v20, %v649_v35  ;;  %v809_v26 = vmul.f32 %v805_v20, %v654_v42 }
 0x406   :  { %v810_v27 = vmul.f32 %v805_v20, %v659_v61 }
 0x407   :  { %v815_v23 = vrot.slane %v800_v21, %v1370_v24 }
 0x409   :  { %v817_v28 = vadd.f32 %v815_v23, %v807_v22  ;;  %v818_v29 = vadd.f32 %v815_v23, %v808_v25  ;;  %v819_v18 = vadd.f32 %v815_v23, %v809_v26  ;;  %v820_v30 = vadd.f32 %v815_v23, %v810_v27 }
 0x40b   :  { %v821_v31 = vmax.f32 %v817_v28, 0.0  ;;  %v822_v32 = vmax.f32 %v818_v29, 0.0  ;;  %v823_v33 = vmax.f32 %v819_v18, 0.0  ;;  %v824_v34 = vmax.f32 %v820_v30, 0.0 }
 0x40d   :  { %825 = vst [vmem:[#allocation11] sm:$0xff] %v821_v31  ;;  %826 = vst [vmem:[#allocation11 + $0x8] sm:$0xff] %v822_v32 }
 0x40e   :  { %827 = vst [vmem:[#allocation11 + $0x10] sm:$0xff] %v823_v33  ;;  %828 = vst [vmem:[#allocation11 + $0x18] sm:$0xff] %v824_v34 }
 0x40f   :  { %1188 = shalt.err (!%p1185_p1)
}
 0x410   :  { %840 = dma.vmem_to_hbm [thread:$0]  %s835_s21, 512, %s1438_s9, [#allocation4], %s1206_s12, %s1206_s12, %s1207_s13  }
 0x411   :  { %1203 = dma.done.wait [#allocation4], 512  }
 0x412   :  { %1204 = vsyncadd [#allocation4], 4294966784 }
 0x413   :  { %844 = vsyncpa [#allocation3], 1 }
 0x414   :  { %845 = vsyncpa [#allocation6], 1 }
 0x415   :  { %846 = vsyncpa [#allocation9], 1 }
 0x416   :  { %847 = vsyncpa [#allocation4], 1 }

</bundles_post_ra>
